<compile_context>
chip_gen: v7x
topology: tpu7x:2x2x1
jax: 0.10.0
libtpu: 0.0.40
codegen_flags: <defaults>
</compile_context>

<pallas_src>
import functools

import jax
import jax.numpy as jnp
from jax.experimental import pallas as pl
from jax.experimental.pallas import tpu as pltpu

LANE = 128            # TPU lane width: every padded tile uses 128 lanes
SUBLANE = 8           # f32 sublane granularity
MAX_BATCH_TILE = 512  # (8,128)-aligned; ~85% of HBM roofline, ~1.5 MiB total VMEM


def _round_up(x, m):
    return (x + m - 1) // m * m


def _batch_tile(B):
    """Pick the batch tile: aim for >=2 grid steps (v7x megacore) once B is large,
    cap at MAX_BATCH_TILE rows, floor at one sublane."""
    bt = _round_up(-(-B // 2), SUBLANE)
    return max(SUBLANE, min(bt, MAX_BATCH_TILE))


# -----------------------------------------------------------------------------
# Kernel
# -----------------------------------------------------------------------------
def actor_kernel(state_ref, w_ref, b_ref, out_ref, x_pad, *, n_hidden_layers):
    """Fused Actor forward on one (BT, state_dim) batch tile.

    state_ref: (BT, state_dim) raw state block (last dim == full array dim).
    w_ref:     (3, 128, 128) packed weights (f32 or bf16):
                 [0] = input Linear(S, H), [1] = the ONE shared hidden Linear(H, H),
                 [2] = fused head (cols 0:A = mean_layer, A:2A = std_layer, rest zero).
    b_ref:     (3, 128) packed biases (f32), same order.
    x_pad:     (BT, 128) f32 VMEM scratch used to lane-pad the raw state in-kernel.
    Zero padding keeps the numerics exact: padded lanes stay 0 through every
    matmul / ReLU / tanh, so the math matches the unpadded PyTorch module.
    """
    w_dtype = w_ref.dtype
    sdim = state_ref.shape[1]

    # Lane-pad the raw state inside the kernel (no host-side pad op / HBM round-trip).
    x_pad[...] = jnp.zeros_like(x_pad)
    x_pad[:, :sdim] = state_ref[...].astype(jnp.float32)

    # Hoisted biases (the Python loop unrolls at trace time; JAX won't CSE re-slices).
    b0 = b_ref[0:1, :]
    bh = b_ref[1:2, :] if n_hidden_layers > 0 else None
    b_head = b_ref[2:3, :]

    # Input layer: Linear(state_dim, hidden_dim) + ReLU (MXU, f32 accumulation).
    h = jnp.dot(x_pad[...].astype(w_dtype), w_ref[0],
                preferred_element_type=jnp.float32) + b0
    h = jnp.maximum(h, 0.0)

    # Shared hidden Linear applied n_hidden_layers times: ReLU between applications,
    # Tanh after the final one (hidden_layers[:-1] drops the last ReLU in PyTorch).
    for i in range(n_hidden_layers):
        h = jnp.dot(h.astype(w_dtype), w_ref[1],
                    preferred_element_type=jnp.float32) + bh
        h = jnp.maximum(h, 0.0) if i < n_hidden_layers - 1 else jnp.tanh(h)
    if n_hidden_layers == 0:  # MLP degenerates to Linear -> ReLU -> Tanh
        h = jnp.tanh(h)

    # Fused mean|std head: a single MXU push and one lane-dense (BT, 128) store.
    out_ref[...] = (jnp.dot(h.astype(w_dtype), w_ref[2],
                            preferred_element_type=jnp.float32)
                    + b_head).astype(out_ref.dtype)


# -----------------------------------------------------------------------------
# Host-side packing (done once, outside the hot path)
# -----------------------------------------------------------------------------
def pack_actor_params(params, state_dim, action_dim, hidden_dim,
                      mxu_dtype=jnp.bfloat16):
    """Pack all weights into one zero-padded (3,128,128) slab (dtype = mxu_dtype: bf16
    is MXU-native on v5e/v6e/v7x; pass jnp.float32 for exact parity) and all biases
    into one f32 (3,128) slab."""
    # TODO(synk): layouts with hidden_dim/state_dim/2*action_dim > 128 would need
    # multi-tile packing; not required for this module's shapes.
    assert state_dim <= LANE and hidden_dim <= LANE and 2 * action_dim <= LANE

    w = jnp.zeros((3, LANE, LANE), jnp.float32)
    w = w.at[0, :state_dim, :hidden_dim].set(params["w0"])
    w = w.at[1, :hidden_dim, :hidden_dim].set(params["wh"])
    w = w.at[2, :hidden_dim, :action_dim].set(params["wm"])
    w = w.at[2, :hidden_dim, action_dim:2 * action_dim].set(params["ws"])
    w_slab = w.astype(mxu_dtype)

    b_slab = jnp.zeros((3, LANE), jnp.float32)
    b_slab = b_slab.at[0, :hidden_dim].set(params["b0"][0])
    b_slab = b_slab.at[1, :hidden_dim].set(params["bh"][0])
    b_slab = b_slab.at[2, :action_dim].set(params["bm"][0])
    b_slab = b_slab.at[2, action_dim:2 * action_dim].set(params["bs"][0])
    return w_slab, b_slab


# -----------------------------------------------------------------------------
# Wrapper (jitted: single dispatch for pad / kernel / output slices)
# -----------------------------------------------------------------------------
@functools.partial(jax.jit, static_argnames=("action_dim", "n_hidden_layers"))
def actor_forward(state, w_slab, b_slab, *, action_dim, n_hidden_layers):
    """Run the fused Actor kernel.  Returns (mean, std), each (B, action_dim)."""
    B, state_dim = state.shape
    state = state.astype(jnp.float32)          # no-op for f32 inputs

    BT = _batch_tile(B)
    B_pad = _round_up(B, BT)
    if B_pad != B:                              # static check; no-op at num_envs=8
        state = jnp.pad(state, ((0, B_pad - B), (0, 0)))

    out = pl.pallas_call(
        functools.partial(actor_kernel, n_hidden_layers=n_hidden_layers),
        out_shape=jax.ShapeDtypeStruct((B_pad, LANE), jnp.float32),
        grid=(B_pad // BT,),
        in_specs=[
            pl.BlockSpec((BT, state_dim), lambda i: (i, 0)),        # raw state tile
            pl.BlockSpec((3, LANE, LANE), lambda i: (0, 0, 0)),     # weights, VMEM-resident
            pl.BlockSpec((3, LANE), lambda i: (0, 0)),              # biases,  VMEM-resident
        ],
        out_specs=pl.BlockSpec((BT, LANE), lambda i: (i, 0)),       # lane-dense output slab
        scratch_shapes=[pltpu.VMEM((BT, LANE), jnp.float32)],       # in-kernel lane-pad buffer
        compiler_params=pltpu.CompilerParams(
            dimension_semantics=("parallel",)),                     # shard batch across TCs
    )(state, w_slab, b_slab)

    mean = out[:B, :action_dim]
    std = out[:B, action_dim:2 * action_dim]
    return mean, std


# -----------------------------------------------------------------------------
# Init + pure-JAX reference
# -----------------------------------------------------------------------------
def init_actor_params(key, state_dim, action_dim, hidden_dim):
    """Deterministic init mimicking torch.nn.Linear (uniform +/- 1/sqrt(fan_in)).

    Weights stored as (in_features, out_features) so y = x @ W + b.
    """
    def linear(k, fan_in, fan_out):
        kw, kb = jax.random.split(k)
        bound = 1.0 / jnp.sqrt(jnp.float32(fan_in))
        w = jax.random.uniform(kw, (fan_in, fan_out), jnp.float32, -bound, bound)
        b = jax.random.uniform(kb, (1, fan_out), jnp.float32, -bound, bound)
        return w, b

    k0, kh, km, ks = jax.random.split(key, 4)
    w0, b0 = linear(k0, state_dim, hidden_dim)   # Linear(state_dim, hidden_dim)
    wh, bh = linear(kh, hidden_dim, hidden_dim)  # the ONE shared hidden Linear
    wm, bm = linear(km, hidden_dim, action_dim)  # mean_layer
    ws, bs = linear(ks, hidden_dim, action_dim)  # std_layer
    return {"w0": w0, "b0": b0, "wh": wh, "bh": bh,
            "wm": wm, "bm": bm, "ws": ws, "bs": bs}


def actor_forward_ref(state, params, *, n_hidden_layers):
    """Pure-JAX reference (unpadded, f32) for correctness checking."""
    h = jnp.maximum(state @ params["w0"] + params["b0"], 0.0)
    for i in range(n_hidden_layers):
        h = h @ params["wh"] + params["bh"]
        h = jnp.maximum(h, 0.0) if i < n_hidden_layers - 1 else jnp.tanh(h)
    if n_hidden_layers == 0:
        h = jnp.tanh(h)
    return h @ params["wm"] + params["bm"], h @ params["ws"] + params["bs"]


if __name__ == "__main__":
    # Pendulum-v1: state_dim=3, action_dim=1; num_envs=8 as in the source file.
    batch = 8
    state_dim = 3
    action_dim = 1
    hidden_dim = 32
    n_hidden_layers = 2

    key = jax.random.PRNGKey(0)
    k_params, k_state = jax.random.split(key)
    params = init_actor_params(k_params, state_dim, action_dim, hidden_dim)
    state = jax.random.normal(k_state, (batch, state_dim), jnp.float32)

    mean_ref, std_ref = actor_forward_ref(state, params,
                                          n_hidden_layers=n_hidden_layers)

    # Exact-parity path: f32 MXU operands, tight tolerance.
    w32, b32 = pack_actor_params(params, state_dim, action_dim, hidden_dim,
                                 mxu_dtype=jnp.float32)
    mean32, std32 = actor_forward(state, w32, b32,
                                  action_dim=action_dim,
                                  n_hidden_layers=n_hidden_layers)
    jax.block_until_ready((mean32, std32))
    assert mean32.shape == (batch, action_dim) and std32.shape == (batch, action_dim)
    assert jnp.allclose(mean32, mean_ref, atol=1e-5, rtol=1e-5)
    assert jnp.allclose(std32, std_ref, atol=1e-5, rtol=1e-5)

    # MXU-native path: bf16 weight slab / bf16 matmul operands, f32 accumulate
    # (the default for production use on v5e/v6e/v7x); looser tolerance expected.
    wbf, bbf = pack_actor_params(params, state_dim, action_dim, hidden_dim,
                                 mxu_dtype=jnp.bfloat16)
    meanbf, stdbf = actor_forward(state, wbf, bbf,
                                  action_dim=action_dim,
                                  n_hidden_layers=n_hidden_layers)
    jax.block_until_ready((meanbf, stdbf))
    assert meanbf.shape == (batch, action_dim) and stdbf.shape == (batch, action_dim)
    assert jnp.allclose(meanbf, mean_ref, atol=5e-2, rtol=5e-2)
    assert jnp.allclose(stdbf, std_ref, atol=5e-2, rtol=5e-2)

    print("KERNEL_OK")
</pallas_src>

<mosaic_0001>
module attributes {stable_mosaic.version = 11 : i64} {
  func.func @actor_kernel(%arg0: i32, %arg1: memref<8x3xf32, #tpu.memory_space<vmem>>, %arg2: memref<3x128x128xf32, #tpu.memory_space<vmem>>, %arg3: memref<3x128xf32, #tpu.memory_space<vmem>>, %arg4: memref<8x128xf32, #tpu.memory_space<vmem>>, %arg5: memref<8x128xf32, #tpu.memory_space<vmem>>) attributes {dimension_semantics = [#tpu.dimension_semantics<parallel>], iteration_bounds = array<i64: 1>, scalar_prefetch = 0 : i64, scratch_operands = 1 : i64, tpu.core_type = #tpu.core_type<tc>, window_params = [{transform_indices = @transform_0, window_bounds = array<i64: 8, 3>}, {pipeline_mode = #tpu.pipeline_mode<synchronous>, transform_indices = @transform_1, window_bounds = array<i64: 3, 128, 128>}, {pipeline_mode = #tpu.pipeline_mode<synchronous>, transform_indices = @transform_2, window_bounds = array<i64: 3, 128>}, {transform_indices = @transform_3, window_bounds = array<i64: 8, 128>}]} {
    %cst = arith.constant 0.000000e+00 : f32
    %0 = vector.broadcast %cst : f32 to vector<8x128xf32>
    %c0 = arith.constant 0 : index
    %c0_0 = arith.constant 0 : index
    %1 = vector.load %arg5[%c0, %c0_0] : memref<8x128xf32, #tpu.memory_space<vmem>>, vector<8x128xf32>
    tpu.vector_store %arg5[%c0, %c0_0], %0 {strides = array<i32>} : memref<8x128xf32, #tpu.memory_space<vmem>>, vector<8x128xf32>,
    %c0_1 = arith.constant 0 : index
    %c0_2 = arith.constant 0 : index
    %2 = vector.load %arg1[%c0_1, %c0_2] : memref<8x3xf32, #tpu.memory_space<vmem>>, vector<8x3xf32>
    %c0_3 = arith.constant 0 : index
    %c0_4 = arith.constant 0 : index
    %3 = vector.load %arg5[%c0_3, %c0_4] : memref<8x128xf32, #tpu.memory_space<vmem>>, vector<8x3xf32>
    tpu.vector_store %arg5[%c0_3, %c0_4], %2 {strides = array<i32>} : memref<8x128xf32, #tpu.memory_space<vmem>>, vector<8x3xf32>,
    %c0_5 = arith.constant 0 : index
    %c0_6 = arith.constant 0 : index
    %4 = vector.load %arg3[%c0_5, %c0_6] : memref<3x128xf32, #tpu.memory_space<vmem>>, vector<1x128xf32>
    %c1 = arith.constant 1 : index
    %c0_7 = arith.constant 0 : index
    %5 = vector.load %arg3[%c1, %c0_7] : memref<3x128xf32, #tpu.memory_space<vmem>>, vector<1x128xf32>
    %c2 = arith.constant 2 : index
    %c0_8 = arith.constant 0 : index
    %6 = vector.load %arg3[%c2, %c0_8] : memref<3x128xf32, #tpu.memory_space<vmem>>, vector<1x128xf32>
    %c0_9 = arith.constant 0 : index
    %c0_10 = arith.constant 0 : index
    %7 = vector.load %arg5[%c0_9, %c0_10] : memref<8x128xf32, #tpu.memory_space<vmem>>, vector<8x128xf32>
    %c0_11 = arith.constant 0 : index
    %c0_12 = arith.constant 0 : index
    %c0_13 = arith.constant 0 : index
    %8 = vector.load %arg2[%c0_11, %c0_12, %c0_13] : memref<3x128x128xf32, #tpu.memory_space<vmem>>, vector<1x128x128xf32>
    %9 = vector.shape_cast %8 : vector<1x128x128xf32> to vector<128x128xf32>
    %cst_14 = arith.constant dense<0.000000e+00> : vector<8x128xf32>
    %10 = tpu.matmul %7, %9, %cst_14 {dimension_numbers = #tpu.dot_dimension_numbers<[1], [0], [0], [1], [0, 0, 1, 1], [], []>} : vector<8x128xf32>, vector<128x128xf32>, vector<8x128xf32> -> vector<8x128xf32>
    %11 = vector.broadcast %4 : vector<1x128xf32> to vector<8x128xf32>
    %12 = arith.addf %10, %11 : vector<8x128xf32>
    %cst_15 = arith.constant 0.000000e+00 : f32
    %13 = vector.broadcast %cst_15 : f32 to vector<8x128xf32>
    %14 = arith.maximumf %12, %13 : vector<8x128xf32>
    %c1_16 = arith.constant 1 : index
    %c0_17 = arith.constant 0 : index
    %c0_18 = arith.constant 0 : index
    %15 = vector.load %arg2[%c1_16, %c0_17, %c0_18] : memref<3x128x128xf32, #tpu.memory_space<vmem>>, vector<1x128x128xf32>
    %16 = vector.shape_cast %15 : vector<1x128x128xf32> to vector<128x128xf32>
    %cst_19 = arith.constant dense<0.000000e+00> : vector<8x128xf32>
    %17 = tpu.matmul %14, %16, %cst_19 {dimension_numbers = #tpu.dot_dimension_numbers<[1], [0], [0], [1], [0, 0, 1, 1], [], []>} : vector<8x128xf32>, vector<128x128xf32>, vector<8x128xf32> -> vector<8x128xf32>
    %18 = vector.broadcast %5 : vector<1x128xf32> to vector<8x128xf32>
    %19 = arith.addf %17, %18 : vector<8x128xf32>
    %cst_20 = arith.constant 0.000000e+00 : f32
    %20 = vector.broadcast %cst_20 : f32 to vector<8x128xf32>
    %21 = arith.maximumf %19, %20 : vector<8x128xf32>
    %c1_21 = arith.constant 1 : index
    %c0_22 = arith.constant 0 : index
    %c0_23 = arith.constant 0 : index
    %22 = vector.load %arg2[%c1_21, %c0_22, %c0_23] : memref<3x128x128xf32, #tpu.memory_space<vmem>>, vector<1x128x128xf32>
    %23 = vector.shape_cast %22 : vector<1x128x128xf32> to vector<128x128xf32>
    %cst_24 = arith.constant dense<0.000000e+00> : vector<8x128xf32>
    %24 = tpu.matmul %21, %23, %cst_24 {dimension_numbers = #tpu.dot_dimension_numbers<[1], [0], [0], [1], [0, 0, 1, 1], [], []>} : vector<8x128xf32>, vector<128x128xf32>, vector<8x128xf32> -> vector<8x128xf32>
    %25 = vector.broadcast %5 : vector<1x128xf32> to vector<8x128xf32>
    %26 = arith.addf %24, %25 : vector<8x128xf32>
    %27 = math.tanh %26 : vector<8x128xf32>
    %c2_25 = arith.constant 2 : index
    %c0_26 = arith.constant 0 : index
    %c0_27 = arith.constant 0 : index
    %28 = vector.load %arg2[%c2_25, %c0_26, %c0_27] : memref<3x128x128xf32, #tpu.memory_space<vmem>>, vector<1x128x128xf32>
    %29 = vector.shape_cast %28 : vector<1x128x128xf32> to vector<128x128xf32>
    %cst_28 = arith.constant dense<0.000000e+00> : vector<8x128xf32>
    %30 = tpu.matmul %27, %29, %cst_28 {dimension_numbers = #tpu.dot_dimension_numbers<[1], [0], [0], [1], [0, 0, 1, 1], [], []>} : vector<8x128xf32>, vector<128x128xf32>, vector<8x128xf32> -> vector<8x128xf32>
    %31 = vector.broadcast %6 : vector<1x128xf32> to vector<8x128xf32>
    %32 = arith.addf %30, %31 : vector<8x128xf32>
    %c0_29 = arith.constant 0 : index
    %c0_30 = arith.constant 0 : index
    %33 = vector.load %arg4[%c0_29, %c0_30] : memref<8x128xf32, #tpu.memory_space<vmem>>, vector<8x128xf32>
    tpu.vector_store %arg4[%c0_29, %c0_30], %32 {strides = array<i32>} : memref<8x128xf32, #tpu.memory_space<vmem>>, vector<8x128xf32>,
    return
  }
  func.func @transform_0(%arg0: i32) -> (i32, i32) {
    %c0_i32 = arith.constant 0 : i32
    %c0_i32_0 = arith.constant 0 : i32
    return %arg0, %c0_i32 : i32, i32
  }
  func.func @transform_1(%arg0: i32) -> (i32, i32, i32) {
    %c0_i32 = arith.constant 0 : i32
    %c0_i32_0 = arith.constant 0 : i32
    %c0_i32_1 = arith.constant 0 : i32
    %c0_i32_2 = arith.constant 0 : i32
    return %c0_i32, %c0_i32_0, %c0_i32_1 : i32, i32, i32
  }
  func.func @transform_2(%arg0: i32) -> (i32, i32) {
    %c0_i32 = arith.constant 0 : i32
    %c0_i32_0 = arith.constant 0 : i32
    %c0_i32_1 = arith.constant 0 : i32
    return %c0_i32, %c0_i32_0 : i32, i32
  }
  func.func @transform_3(%arg0: i32) -> (i32, i32) {
    %c0_i32 = arith.constant 0 : i32
    %c0_i32_0 = arith.constant 0 : i32
    return %arg0, %c0_i32 : i32, i32
  }
}

</mosaic_0001>

<bundles_post_ra>
// kernel: actor_forward.1
= control target key start
LH: loop header
LB: loop body
LE: loop exit
PB: predicated region body
PF: predicated region fallthrough
CT: control target
= control target key end

     0   :  { %8 = vsyncpa [#allocation4], 0  ;;  %s726_s12 = smov [#allocation3]   ;;  %s820_s0 = inlined_call_operand.vmem [shape: f32[8,3], index: 0, kind: input, shape index: {}]   ;;  %s821_s1 = inlined_call_operand.hbm [shape: f32[3,128,128], index: 1, kind: input, shape index: {}]   ;;  %s822_s2 = inlined_call_operand.vmem [shape: f32[3,128], index: 2, kind: input, shape index: {}]   ;;  %s823_s3 = inlined_call_operand.vmem [shape: f32[8,128], index: 3, kind: output, shape index: {}]  }
   0x1   :  { %s16_s13 = sshll.u32 %s726_s12, 4  ;;  %s702_s16 = scalar_lea.hbm %s821_s1, 6144  ;;  %s17_s13 = int_to_ptr.vmem [resolvable:$true] %s16_s13 }
   0x2   :  { %p703_p0 = scmp.ne.s32.totalorder %s821_s1, %s702_s16  ;;  %p706_p1 = scmp.lt.u32.totalorder %s702_s16, %s821_s1 }
   0x4   :  { %p708_p2 = pnand %p706_p1, %p703_p0 }
   0x6   :  { %711 = shalt.err (!%p708_p2)
}
   0x7   :  { %s712_s21 = scalar_lea.vmem %s17_s13, 6144  ;;  %p717_p4 = scmp.lt.s32.totalorder %s17_s13, %s17_s13 }
   0x8   :  { %p713_p3 = scmp.ne.s32.totalorder %s17_s13, %s712_s21  ;;  %p718_p5 = scmp.lt.s32.totalorder %s712_s21, %s712_s21 }
   0xa   :  { %p719_p6 = por %p718_p5, %p717_p4 }
   0xc   :  { %p720_p7 = pnand %p719_p6, %p713_p3 }
   0xe   :  { %723 = shalt.err (!%p720_p7)
}
   0xf   :  { %s727_s22 = smov 128   ;;  %s728_s23 = smov 8  }
  0x10   :  { %22 = dma.hbm_to_vmem [thread:$0]  %s821_s1, 6144, %s17_s13, [#allocation4], %s727_s22, %s727_s22, %s728_s23  }
  0x11   :  { %724 = dma.done.wait [#allocation4], 6144  }
  0x12   :  { %725 = vsyncadd [#allocation4], 4294961152  ;;  %v729_v0 = vmov 0.0|0.0   ;;  %v730_v1 = vmov 0.0   ;;  %vm731_vm0 = vmmov 0   ;;  %v36_v2 = vld [vmem:[#allocation3] sm:$0xff] }
  0x13   :  { %598 = vmatprep.subr.bf16.mxu0 %v729_v0  ;;  %28 = vst [vmem:[#allocation2] sm:$0xff] %v730_v1  ;;  %490 = vmatprep.mubr.msk.f32.mxu0 %vm731_vm0, %v730_v1  ;;  %v37_v3 = vld [vmem:[#allocation3 + $0x8] sm:$0xff]  ;;  %v38_v4 = vld [vmem:[#allocation3 + $0x10] sm:$0xff]  ;;  %v39_v6 = vld [vmem:[#allocation3 + $0x18] sm:$0xff]  ;;  %vm30_vm1 = vcmask 23552  }
  0x14   :  { %622 = vmatprep.subr.bf16.mxu1 %v729_v0  ;;  %525 = vmatprep.mubr.msk.f32.mxu1 %vm731_vm0, %v730_v1  ;;  %v599_v5 = vpack.c.bf16 %v37_v3, %v36_v2  ;;  %v602_v7 = vpack.c.bf16 %v39_v6, %v38_v4  ;;  %v40_v8 = vld [vmem:[#allocation3 + $0x20] sm:$0xff]  ;;  %v41_v9 = vld [vmem:[#allocation3 + $0x28] sm:$0xff]  ;;  %v29_v10 = vld [vmem:[%s820_s0] sm:$0xff] }
  0x15   :  { %v128_v11 = vld [vmem:[#allocation3 + $0x80] sm:$0xff]  ;;  %31 = vst.msk [vmem:[#allocation2] sm:$0xff] %vm30_vm1, %v29_v10  ;;  %v129_v12 = vld [vmem:[#allocation3 + $0x88] sm:$0xff]  ;;  %v130_v13 = vld [vmem:[#allocation3 + $0x90] sm:$0xff]  ;;  %v605_v15 = vpack.c.bf16 %v41_v9, %v40_v8 }
  0x16   :  { %600 = vmatpush3.bf16.msra.mxu0 %v599_v5  ;;  %v131_v14 = vld [vmem:[#allocation3 + $0x98] sm:$0xff]  ;;  %v623_v16 = vpack.c.bf16 %v129_v12, %v128_v11  ;;  %v42_v17 = vld [vmem:[#allocation3 + $0x30] sm:$0xff]  ;;  %v132_v20 = vld [vmem:[#allocation3 + $0xa0] sm:$0xff] }
  0x17   :  { %601 = vmatprep.subr.bf16.mxu0 %v729_v0  ;;  %v43_v18 = vld [vmem:[#allocation3 + $0x38] sm:$0xff]  ;;  %v626_v19 = vpack.c.bf16 %v131_v14, %v130_v13  ;;  %v133_v21 = vld [vmem:[#allocation3 + $0xa8] sm:$0xff]  ;;  %v44_v23 = vld [vmem:[#allocation3 + $0x40] sm:$0xff] }
  0x18   :  { %624 = vmatpush3.bf16.msra.mxu1 %v623_v16  ;;  %v608_v22 = vpack.c.bf16 %v43_v18, %v42_v17  ;;  %v45_v24 = vld [vmem:[#allocation3 + $0x48] sm:$0xff]  ;;  %v629_v25 = vpack.c.bf16 %v133_v21, %v132_v20  ;;  %v134_v26 = vld [vmem:[#allocation3 + $0xb0] sm:$0xff]  ;;  %v135_v27 = vld [vmem:[#allocation3 + $0xb8] sm:$0xff] }
  0x19   :  { %625 = vmatprep.subr.bf16.mxu1 %v729_v0  ;;  %v611_v28 = vpack.c.bf16 %v45_v24, %v44_v23  ;;  %v46_v29 = vld [vmem:[#allocation3 + $0x50] sm:$0xff]  ;;  %v47_v30 = vld [vmem:[#allocation3 + $0x58] sm:$0xff]  ;;  %v632_v31 = vpack.c.bf16 %v135_v27, %v134_v26  ;;  %v136_v32 = vld [vmem:[#allocation3 + $0xc0] sm:$0xff] }
  0x1a   :  { %603 = vmatpush3.bf16.msra.mxu0 %v602_v7  ;;  %v137_v33 = vld [vmem:[#allocation3 + $0xc8] sm:$0xff]  ;;  %v614_v34 = vpack.c.bf16 %v47_v30, %v46_v29  ;;  %v48_v35 = vld [vmem:[#allocation3 + $0x60] sm:$0xff]  ;;  %v138_v38 = vld [vmem:[#allocation3 + $0xd0] sm:$0xff] }
  0x1b   :  { %604 = vmatprep.subr.bf16.mxu0 %v729_v0  ;;  %v49_v36 = vld [vmem:[#allocation3 + $0x68] sm:$0xff]  ;;  %v635_v37 = vpack.c.bf16 %v137_v33, %v136_v32  ;;  %v139_v39 = vld [vmem:[#allocation3 + $0xd8] sm:$0xff]  ;;  %v50_v41 = vld [vmem:[#allocation3 + $0x70] sm:$0xff] }
  0x1c   :  { %627 = vmatpush3.bf16.msra.mxu1 %v626_v19  ;;  %v617_v40 = vpack.c.bf16 %v49_v36, %v48_v35  ;;  %v51_v42 = vld [vmem:[#allocation3 + $0x78] sm:$0xff]  ;;  %v638_v43 = vpack.c.bf16 %v139_v39, %v138_v38  ;;  %v140_v44 = vld [vmem:[#allocation3 + $0xe0] sm:$0xff]  ;;  %v141_v45 = vld [vmem:[#allocation3 + $0xe8] sm:$0xff] }
  0x1d   :  { %628 = vmatprep.subr.bf16.mxu1 %v729_v0  ;;  %v620_v46 = vpack.c.bf16 %v51_v42, %v50_v41  ;;  %v641_v47 = vpack.c.bf16 %v141_v45, %v140_v44  ;;  %v35_v48 = vld [vmem:[#allocation2] sm:$0xff]  ;;  %v142_v49 = vld [vmem:[#allocation3 + $0xf0] sm:$0xff]  ;;  %v291_v57 = vld [vmem:[#allocation3 + $0x100] sm:$0xff] }
  0x1e   :  { %606 = vmatpush3.bf16.msra.mxu0 %v605_v15  ;;  %v143_v50 = vld [vmem:[#allocation3 + $0xf8] sm:$0xff]  ;;  %v292_v58 = vld [vmem:[#allocation3 + $0x108] sm:$0xff]  ;;  %v293_v59 = vld [vmem:[#allocation3 + $0x110] sm:$0xff] }
  0x1f   :  { %607 = vmatprep.subr.bf16.mxu0 %v729_v0  ;;  %v644_v51 = vpack.c.bf16 %v143_v50, %v142_v49  ;;  %v387_v52 = vld [vmem:[%s822_s2] ss:$0 sm:$0xff]  ;;  %v671_v60 = vpack.c.bf16 %v292_v58, %v291_v57  ;;  %v295_v63 = vld [vmem:[#allocation3 + $0x120] sm:$0xff]  ;;  %v296_v2 = vld [vmem:[#allocation3 + $0x128] sm:$0xff] }
  0x20   :  { %630 = vmatpush3.bf16.msra.mxu1 %v629_v25  ;;  %v294_v61 = vld [vmem:[#allocation3 + $0x118] sm:$0xff]  ;;  %v677_v3 = vpack.c.bf16 %v296_v2, %v295_v63  ;;  %v297_v4 = vld [vmem:[#allocation3 + $0x130] sm:$0xff]  ;;  %v300_v7 = vld [vmem:[#allocation3 + $0x148] sm:$0xff] }
  0x21   :  { %631 = vmatprep.subr.bf16.mxu1 %v729_v0  ;;  %v674_v62 = vpack.c.bf16 %v294_v61, %v293_v59  ;;  %v298_v5 = vld [vmem:[#allocation3 + $0x138] sm:$0xff]  ;;  %v301_v14 = vld [vmem:[#allocation3 + $0x150] sm:$0xff]  ;;  %v303_v17 = vld [vmem:[#allocation3 + $0x160] sm:$0xff] }
  0x22   :  { %609 = vmatpush3.bf16.msra.mxu0 %v608_v22  ;;  %v680_v6 = vpack.c.bf16 %v298_v5, %v297_v4  ;;  %v388_v9 = vld [vmem:[%s822_s2 + $0x1] ss:$0 sm:$0xff]  ;;  %v304_v18 = vld [vmem:[#allocation3 + $0x168] sm:$0xff]  ;;  %v305_v20 = vld [vmem:[#allocation3 + $0x170] sm:$0xff] }
  0x23   :  { %610 = vmatprep.subr.bf16.mxu0 %v729_v0  ;;  %v302_v15 = vld [vmem:[#allocation3 + $0x158] sm:$0xff] }
  0x24   :  { %633 = vmatpush3.bf16.msra.mxu1 %v632_v31  ;;  %v306_v21 = vld [vmem:[#allocation3 + $0x178] sm:$0xff] }
  0x25   :  { %634 = vmatprep.subr.bf16.mxu1 %v729_v0  ;;  %v692_v22 = vpack.c.bf16 %v306_v21, %v305_v20  ;;  %v389_v27 = vld [vmem:[%s822_s2 + $0x2] ss:$0 sm:$0xff] }
  0x26   :  { %612 = vmatpush3.bf16.msra.mxu0 %v611_v28 }
  0x27   :  { %613 = vmatprep.subr.bf16.mxu0 %v729_v0 }
  0x28   :  { %636 = vmatpush3.bf16.msra.mxu1 %v635_v37 }
  0x29   :  { %637 = vmatprep.subr.bf16.mxu1 %v729_v0 }
  0x2a   :  { %615 = vmatpush3.bf16.msra.mxu0 %v614_v34 }
  0x2b   :  { %616 = vmatprep.subr.bf16.mxu0 %v729_v0 }
  0x2c   :  { %639 = vmatpush3.bf16.msra.mxu1 %v638_v43 }
  0x2d   :  { %640 = vmatprep.subr.bf16.mxu1 %v729_v0 }
  0x2e   :  { %618 = vmatpush3.bf16.msra.mxu0 %v617_v40 }
  0x2f   :  { %619 = vmatprep.subr.bf16.mxu0 %v729_v0 }
  0x30   :  { %642 = vmatpush3.bf16.msra.mxu1 %v641_v47 }
  0x31   :  { %643 = vmatprep.subr.bf16.mxu1 %v729_v0 }
  0x32   :  { %621 = vmatpush3.bf16.msra.mxu0 %v620_v46 }
  0x33   :  { %646 = vmatprep.subr.bf16.mxu0 %v729_v0 }
  0x34   :  { %645 = vmatpush3.bf16.msra.mxu1 %v644_v51 }
  0x35   :  { %491 = vmatmul.mubr.f32.vlgmr.msra.gmra.mrb[0].mxu0 %v35_v48  ;;  %670 = vmatprep.subr.bf16.mxu1 %v729_v0 }
  0x36   :  { %648 = vmatpush3.bf16.msra.mxu0 %v623_v16  ;;  %560 = vmatprep.mubr.msk.f32.mxu0 %vm731_vm0, %v730_v1  ;;  %v686_v16 = vpack.c.bf16 %v302_v15, %v301_v14 }
  0x37   :  { %649 = vmatprep.subr.bf16.mxu0 %v729_v0 }
  0x3a   :  { %651 = vmatpush3.bf16.msra.mxu0 %v626_v19  ;;  %v689_v19 = vpack.c.bf16 %v304_v18, %v303_v17 }
  0x3b   :  { %652 = vmatprep.subr.bf16.mxu0 %v729_v0 }
  0x3e   :  { %654 = vmatpush3.bf16.msra.mxu0 %v629_v25 }
  0x3f   :  { %655 = vmatprep.subr.bf16.mxu0 %v729_v0 }
  0x42   :  { %657 = vmatpush3.bf16.msra.mxu0 %v632_v31 }
  0x43   :  { %658 = vmatprep.subr.bf16.mxu0 %v729_v0 }
  0x46   :  { %660 = vmatpush3.bf16.msra.mxu0 %v635_v37 }
  0x47   :  { %661 = vmatprep.subr.bf16.mxu0 %v729_v0 }
  0x4a   :  { %663 = vmatpush3.bf16.msra.mxu0 %v638_v43 }
  0x4b   :  { %664 = vmatprep.subr.bf16.mxu0 %v729_v0 }
  0x4e   :  { %666 = vmatpush3.bf16.msra.mxu0 %v641_v47 }
  0x4f   :  { %667 = vmatprep.subr.bf16.mxu0 %v729_v0 }
  0x52   :  { %669 = vmatpush3.bf16.msra.mxu0 %v644_v51 }
 0x108   :  { %v122_v53 = vpop.f32.mrb[0].mxu0 }
 0x109   :  { %v123_v54 = vadd.f32 %v387_v52, %v122_v53  ;;  %v492_v55 = vpop.f32.mrb[1].mxu0 }
 0x10b   :  { %v126_v56 = vmax.f32 %v123_v54, 0.0 }
 0x10d   :  { %526 = vmatmul.mubr.f32.vlgmr.msra.gmra.mrb[0].mxu1 %v126_v56 }
 0x10e   :  { %595 = vmatprep.mubr.msk.f32.mxu1 %vm731_vm0, %v730_v1  ;;  %672 = vmatpush3.bf16.msra.mxu1 %v671_v60  ;;  %v299_v1 = vld [vmem:[#allocation3 + $0x140] sm:$0xff] }
 0x10f   :  { %673 = vmatprep.subr.bf16.mxu1 %v729_v0  ;;  %v683_v8 = vpack.c.bf16 %v300_v7, %v299_v1 }
 0x112   :  { %675 = vmatpush3.bf16.msra.mxu1 %v674_v62 }
 0x113   :  { %676 = vmatprep.subr.bf16.mxu1 %v729_v0 }
 0x116   :  { %678 = vmatpush3.bf16.msra.mxu1 %v677_v3 }
 0x117   :  { %679 = vmatprep.subr.bf16.mxu1 %v729_v0 }
 0x11a   :  { %681 = vmatpush3.bf16.msra.mxu1 %v680_v6 }
 0x11b   :  { %682 = vmatprep.subr.bf16.mxu1 %v729_v0 }
 0x11e   :  { %684 = vmatpush3.bf16.msra.mxu1 %v683_v8 }
 0x11f   :  { %685 = vmatprep.subr.bf16.mxu1 %v729_v0 }
 0x122   :  { %687 = vmatpush3.bf16.msra.mxu1 %v686_v16 }
 0x123   :  { %688 = vmatprep.subr.bf16.mxu1 %v729_v0 }
 0x126   :  { %690 = vmatpush3.bf16.msra.mxu1 %v689_v19 }
 0x127   :  { %691 = vmatprep.subr.bf16.mxu1 %v729_v0 }
 0x12a   :  { %693 = vmatpush3.bf16.msra.mxu1 %v692_v22 }
 0x1e0   :  { %v214_v10 = vpop.f32.mrb[0].mxu1 }
 0x1e1   :  { %v215_v11 = vadd.f32 %v388_v9, %v214_v10  ;;  %v527_v12 = vpop.f32.mrb[1].mxu1 }
 0x1e3   :  { %v218_v13 = vmax.f32 %v215_v11, 0.0 }
 0x1e5   :  { %561 = vmatmul.mubr.f32.vlgmr.msra.gmra.mrb[2].mxu0 %v218_v13 }
 0x2b8   :  { %v285_v23 = vpop.f32.mrb[2].mxu0 }
 0x2b9   :  { %v286_v24 = vadd.f32 %v388_v9, %v285_v23  ;;  %v562_v25 = vpop.f32.mrb[3].mxu0 }
 0x2bb   :  { %700 = vtanh.f32 %v286_v24 }
 0x2c5   :  { %v701_v26 = vpop.eup %700 }
 0x2c6   :  { %596 = vmatmul.mubr.f32.vlgmr.msra.gmra.mrb[2].mxu1 %v701_v26 }
 0x399   :  { %v377_v28 = vpop.f32.mrb[2].mxu1 }
 0x39a   :  { %v378_v29 = vadd.f32 %v389_v27, %v377_v28  ;;  %v597_v30 = vpop.f32.mrb[3].mxu1 }
 0x39c   :  { %381 = vst [vmem:[%s823_s3] sm:$0xff] %v378_v29 }
 0x39d   :  { %386 = vsyncpa [#allocation4], 1 }

</bundles_post_ra>
